<compile_context>
chip_gen: v7x
topology: tpu7x:2x2x1
jax: 0.10.0
libtpu: 0.0.40
codegen_flags: <defaults>
</compile_context>

<pallas_src>
import functools

import jax
import jax.numpy as jnp
from jax.experimental import pallas as pl
from jax.experimental.pallas import tpu as pltpu


def _round_up(x, m):
    return (x + m - 1) // m * m


def _tile_bytes(r, c, itemsize):
    # VMEM footprint of an (r, c) tile after (8, 128) layout padding.
    return _round_up(max(r, 1), 8) * _round_up(max(c, 1), 128) * itemsize


def _vmem_capacity_bytes():
    try:
        cap = getattr(pltpu.get_tpu_info(), "vmem_capacity_bytes", None)
        if cap:
            return int(cap)
    except Exception:
        pass
    return 64 * 1024 * 1024   # conservative fallback: v7x per-TensorCore VMEM


def _triplet_hard_kernel(src_ref, tgt_t_ref, x2_ref, y2_ref, lab_r_ref, lab_c_ref,
                         out_ref, ap_ref, an_ref, *, margin):
    j = pl.program_id(1)

    @pl.when(j == 0)
    def _init():
        ap_ref[...] = jnp.full_like(ap_ref, -jnp.inf)  # running max of (y2 - 2xy) over positives
        an_ref[...] = jnp.full_like(an_ref, jnp.inf)   # running min of (y2 - 2xy) over negatives

    # MXU: (TM, Dp) @ (Dp, TN) with f32 accumulation (features may be bf16).
    xy = jnp.dot(src_ref[...], tgt_t_ref[...], preferred_element_type=jnp.float32)

    # Partial distance: full dist = x2 + t.  The x2 add and the ReLU clamp are
    # hoisted to the finalize (max(.,0) commutes with row-wise max/min), saving
    # two full (TM, TN) VPU passes per inner step.
    t = y2_ref[...] - 2.0 * xy                                   # (TM, TN) f32

    # Padded columns are excluded by construction: their label is a sentinel
    # that never equals a real label (so never "same" -> can't win the max) and
    # their y2 is +inf (so t = +inf -> can't win the min).  No iota mask needed.
    same = lab_r_ref[...] == lab_c_ref[...]                      # (TM, TN)

    ap_ref[...] = jnp.maximum(
        ap_ref[...], jnp.max(jnp.where(same, t, -jnp.inf), axis=1, keepdims=True))
    an_ref[...] = jnp.minimum(
        an_ref[...], jnp.min(jnp.where(same, jnp.inf, t), axis=1, keepdims=True))

    @pl.when(j == pl.num_programs(1) - 1)
    def _finalize():
        x2 = x2_ref[...]                                         # (TM, 1)
        dist_ap = jnp.maximum(x2 + ap_ref[...], 0.0)
        dist_an = jnp.maximum(x2 + an_ref[...], 0.0)
        # MarginRankingLoss(margin)(dist_an, dist_ap, y=1), per sample:
        #   max(0, dist_ap - dist_an + margin)
        out_ref[...] = jnp.maximum(dist_ap - dist_an + jnp.float32(margin), 0.0)


def triplet_hard_mining(src_feat, tgt_feat, labels, margin=0.3, *,
                        tm=None, tn=None, matmul_dtype=jnp.bfloat16):
    n, d = src_feat.shape
    assert tgt_feat.shape == (n, d)
    assert labels.shape[0] == n
    f32 = jnp.float32

    feat_dtype = jnp.dtype(matmul_dtype if matmul_dtype is not None else src_feat.dtype)
    feat_isz = feat_dtype.itemsize

    dp = _round_up(d, 128)
    n_pad8 = _round_up(n, 8)
    n_pad128 = _round_up(n, 128)
    cap = _vmem_capacity_bytes()

    # Row tile: 512 on 128 MiB-VMEM parts (v5e/v6e) to halve tgt re-streaming,
    # 256 otherwise.  Guarantee >= 2 row blocks when possible so the 'parallel'
    # row axis can shard across the two v7x TensorCores.
    if tm is None:
        tm = 512 if cap >= 96 * 1024 * 1024 else 256
    tm = min(_round_up(tm, 8), n_pad8)
    if n_pad8 // tm < 2 and n_pad8 >= 16:
        tm = _round_up((n_pad8 + 1) // 2, 8)
    n_r = _round_up(n, tm)

    # Column tile: keep the whole tgt^T resident as a single column block when
    # it is small; otherwise 512-wide lane-dense tiles, balanced so padding
    # waste on the last block stays small.
    if tn is None:
        tn_target = n_pad128 if dp * n_pad128 * feat_isz <= 4 * 1024 * 1024 else 512
    else:
        tn_target = tn
    tn_target = max(128, _round_up(tn_target, 128))
    n_col_blocks = max(1, -(-n_pad128 // tn_target))
    tn = _round_up(-(-n_pad128 // n_col_blocks), 128)
    n_c = _round_up(n, tn)

    # Features: zero-padded (padding contributes 0 to xy), cast for the MXU.
    src_p = jnp.zeros((n_r, dp), feat_dtype).at[:n, :d].set(src_feat.astype(feat_dtype))
    tgt_t = jnp.zeros((dp, n_c), feat_dtype).at[:d, :n].set(tgt_feat.astype(feat_dtype).T)

    # Squared norms, always f32, computed once from the original-precision features.
    x2 = jnp.sum(src_feat.astype(f32) ** 2, axis=1)
    y2 = jnp.sum(tgt_feat.astype(f32) ** 2, axis=1)
    x2_p = jnp.zeros((n_r, 1), f32).at[:n, 0].set(x2)
    # Padded columns get +inf so they can never be the hardest negative.
    y2_p = jnp.full((1, n_c), jnp.inf, f32).at[0, :n].set(y2)

    # Labels: padded columns get a sentinel that cannot equal any real label
    # (so they can never be the hardest positive); padded rows get a different
    # sentinel (their outputs are discarded before the mean anyway).
    int_min = jnp.iinfo(jnp.int32).min
    lab = labels.astype(jnp.int32)
    lab_r = jnp.full((n_r, 1), int_min + 1, jnp.int32).at[:n, 0].set(lab)
    lab_c = jnp.full((1, n_c), int_min, jnp.int32).at[0, :n].set(lab)

    # Right-size the VMEM limit: double-buffered tiles + scratch + headroom,
    # clamped below the physical per-core capacity (v7x has only 64 MiB).
    need = 2 * (_tile_bytes(tm, dp, feat_isz) + _tile_bytes(dp, tn, feat_isz)
                + 2 * _tile_bytes(tm, 1, 4) + 2 * _tile_bytes(1, tn, 4)
                + _tile_bytes(tm, 1, 4))
    need += 2 * _tile_bytes(tm, 1, 4)   # ap / an scratch
    vmem_limit = int(min(max(need + 16 * 1024 * 1024, 32 * 1024 * 1024),
                         cap - 8 * 1024 * 1024, 100 * 1024 * 1024))

    cost = pl.CostEstimate(
        flops=2 * n_r * n_c * dp,
        transcendentals=0,
        bytes_accessed=int(n_r * dp * feat_isz + (n_r // tm) * dp * n_c * feat_isz
                           + 2 * 4 * (n_r + n_c) + 4 * n_r))

    kernel = functools.partial(_triplet_hard_kernel, margin=float(margin))

    per_sample = pl.pallas_call(
        kernel,
        out_shape=jax.ShapeDtypeStruct((n_r, 1), jnp.float32),
        grid=(n_r // tm, n_c // tn),
        in_specs=[
            pl.BlockSpec((tm, dp), lambda i, j: (i, 0)),   # src rows (resident over j)
            pl.BlockSpec((dp, tn), lambda i, j: (0, j)),   # tgt^T column stream
            # TODO(synk): if profiling on v5e shows exposed DMA on this stream,
            # add pipeline_mode=pl.Buffered(3) to the tgt^T / y2 / lab_c specs.
            pl.BlockSpec((tm, 1), lambda i, j: (i, 0)),    # x2 row norms (finalize only)
            pl.BlockSpec((1, tn), lambda i, j: (0, j)),    # y2 col norms (+inf padding)
            pl.BlockSpec((tm, 1), lambda i, j: (i, 0)),    # row labels
            pl.BlockSpec((1, tn), lambda i, j: (0, j)),    # col labels (sentinel padding)
        ],
        out_specs=pl.BlockSpec((tm, 1), lambda i, j: (i, 0)),
        scratch_shapes=[pltpu.VMEM((tm, 1), jnp.float32),  # running hardest positive (partial)
                        pltpu.VMEM((tm, 1), jnp.float32)], # running hardest negative (partial)
        compiler_params=pltpu.CompilerParams(
            dimension_semantics=("parallel", "arbitrary"),
            vmem_limit_bytes=vmem_limit),
        cost_estimate=cost,
    )(src_p, tgt_t, x2_p, y2_p, lab_r, lab_c)

    # TODO(synk): the PyTorch `recorder` side-channel (tri_vis logging of
    # dist_ap/dist_an) is not reproduced; only the scalar loss is returned.
    return jnp.mean(per_sample[:n, 0])


def _reference(src_feat, tgt_feat, labels, margin=0.3, matmul_dtype=None):
    # Pure-JAX reference mirroring the PyTorch module (optionally with the same
    # bf16 cast on the cross term as the optimized kernel path).
    f32 = jnp.float32
    x2 = jnp.sum(src_feat.astype(f32) ** 2, axis=1, keepdims=True)
    y2 = jnp.sum(tgt_feat.astype(f32) ** 2, axis=1, keepdims=True)
    if matmul_dtype is None:
        xy = src_feat.astype(f32) @ tgt_feat.astype(f32).T
    else:
        xy = jnp.dot(src_feat.astype(matmul_dtype), tgt_feat.astype(matmul_dtype).T,
                     preferred_element_type=f32)
    dist = jnp.maximum(x2 + y2.T - 2.0 * xy, 0.0)
    mask = labels[:, None] == labels[None, :]
    dist_ap = jnp.max(jnp.where(mask, dist, -jnp.inf), axis=1)
    dist_an = jnp.min(jnp.where(mask, jnp.inf, dist), axis=1)
    return jnp.mean(jnp.maximum(dist_ap - dist_an + margin, 0.0))


if __name__ == "__main__":
    key = jax.random.PRNGKey(0)
    k1, k2 = jax.random.split(key)

    # Case 1: tiny batch, single tile.
    N, D = 8, 32
    src = jax.random.normal(k1, (N, D), dtype=jnp.float32)
    tgt = jax.random.normal(k2, (N, D), dtype=jnp.float32)
    labels = jnp.array([0, 0, 1, 1, 2, 2, 3, 3], dtype=jnp.int32)

    # Exact (f32 contraction) path vs exact reference.
    loss_f32 = triplet_hard_mining(src, tgt, labels, margin=0.3, matmul_dtype=None)
    jax.block_until_ready(loss_f32)
    ref = _reference(src, tgt, labels, margin=0.3)
    assert jnp.allclose(loss_f32, ref, rtol=1e-4, atol=1e-4), (loss_f32, ref)

    # Default (bf16 contraction) path vs a bf16-matched reference, plus a loose
    # sanity check against the exact f32 value.
    loss_bf16 = triplet_hard_mining(src, tgt, labels, margin=0.3)
    jax.block_until_ready(loss_bf16)
    ref_bf16 = _reference(src, tgt, labels, margin=0.3, matmul_dtype=jnp.bfloat16)
    assert jnp.allclose(loss_bf16, ref_bf16, rtol=1e-3, atol=1e-3), (loss_bf16, ref_bf16)
    assert jnp.allclose(loss_bf16, ref, rtol=5e-2, atol=5e-2), (loss_bf16, ref)

    # Case 2: non-aligned N/D exercising row/column padding and a (2, 2) grid
    # (2 row blocks, 2 column blocks -> init/accumulate/finalize path).
    k3, k4 = jax.random.split(jax.random.PRNGKey(1))
    N2, D2 = 136, 48
    src2 = jax.random.normal(k3, (N2, D2), dtype=jnp.float32)
    tgt2 = jax.random.normal(k4, (N2, D2), dtype=jnp.float32)
    labels2 = (jnp.arange(N2) % 4).astype(jnp.int32)

    loss2 = triplet_hard_mining(src2, tgt2, labels2, margin=0.3,
                                tn=128, matmul_dtype=None)
    jax.block_until_ready(loss2)
    ref2 = _reference(src2, tgt2, labels2, margin=0.3)
    assert jnp.allclose(loss2, ref2, rtol=1e-4, atol=1e-4), (loss2, ref2)

    print("KERNEL_OK")
</pallas_src>

<mosaic_0001>
module attributes {stable_mosaic.version = 11 : i64} {
  func.func @_triplet_hard_kernel(%arg0: i32, %arg1: i32, %arg2: memref<8x128xf32, #tpu.memory_space<vmem>>, %arg3: memref<128x128xf32, #tpu.memory_space<vmem>>, %arg4: memref<8x1xf32, #tpu.memory_space<vmem>>, %arg5: memref<1x128xf32, #tpu.memory_space<vmem>>, %arg6: memref<8x1xi32, #tpu.memory_space<vmem>>, %arg7: memref<1x128xi32, #tpu.memory_space<vmem>>, %arg8: memref<8x1xf32, #tpu.memory_space<vmem>>, %arg9: memref<8x1xf32, #tpu.memory_space<vmem>>, %arg10: memref<8x1xf32, #tpu.memory_space<vmem>>) attributes {dimension_semantics = [#tpu.dimension_semantics<parallel>, #tpu.dimension_semantics<arbitrary>], iteration_bounds = array<i64: 1, 1>, scalar_prefetch = 0 : i64, scratch_operands = 2 : i64, tpu.core_type = #tpu.core_type<tc>, window_params = [{transform_indices = @transform_0, window_bounds = array<i64: 8, 128>}, {transform_indices = @transform_1, window_bounds = array<i64: 128, 128>}, {transform_indices = @transform_2, window_bounds = array<i64: 8, 1>}, {transform_indices = @transform_3, window_bounds = array<i64: 1, 128>}, {transform_indices = @transform_4, window_bounds = array<i64: 8, 1>}, {transform_indices = @transform_5, window_bounds = array<i64: 1, 128>}, {transform_indices = @transform_6, window_bounds = array<i64: 8, 1>}]} {
    %c0_i32 = arith.constant 0 : i32
    %0 = arith.cmpi eq, %arg1, %c0_i32 : i32
    %1 = arith.extui %0 : i1 to i32
    %c0_i32_0 = arith.constant 0 : i32
    %2 = arith.cmpi ne, %1, %c0_i32_0 : i32
    scf.if %2 {
      %cst_25 = arith.constant 0xFF800000 : f32
      %33 = vector.broadcast %cst_25 : f32 to vector<8x1xf32>
      %c0_26 = arith.constant 0 : index
      %c0_27 = arith.constant 0 : index
      %34 = vector.load %arg9[%c0_26, %c0_27] : memref<8x1xf32, #tpu.memory_space<vmem>>, vector<8x1xf32>
      tpu.vector_store %arg9[%c0_26, %c0_27], %33 {strides = array<i32>} : memref<8x1xf32, #tpu.memory_space<vmem>>, vector<8x1xf32>,
      %cst_28 = arith.constant 0x7F800000 : f32
      %35 = vector.broadcast %cst_28 : f32 to vector<8x1xf32>
      %c0_29 = arith.constant 0 : index
      %c0_30 = arith.constant 0 : index
      %36 = vector.load %arg10[%c0_29, %c0_30] : memref<8x1xf32, #tpu.memory_space<vmem>>, vector<8x1xf32>
      tpu.vector_store %arg10[%c0_29, %c0_30], %35 {strides = array<i32>} : memref<8x1xf32, #tpu.memory_space<vmem>>, vector<8x1xf32>,
    } else {
    }
    %c0 = arith.constant 0 : index
    %c0_1 = arith.constant 0 : index
    %3 = vector.load %arg2[%c0, %c0_1] : memref<8x128xf32, #tpu.memory_space<vmem>>, vector<8x128xf32>
    %c0_2 = arith.constant 0 : index
    %c0_3 = arith.constant 0 : index
    %4 = vector.load %arg3[%c0_2, %c0_3] : memref<128x128xf32, #tpu.memory_space<vmem>>, vector<128x128xf32>
    %cst = arith.constant dense<0.000000e+00> : vector<8x128xf32>
    %5 = tpu.matmul %3, %4, %cst {dimension_numbers = #tpu.dot_dimension_numbers<[1], [0], [0], [1], [0, 0, 1, 1], [], []>} : vector<8x128xf32>, vector<128x128xf32>, vector<8x128xf32> -> vector<8x128xf32>
    %c0_4 = arith.constant 0 : index
    %c0_5 = arith.constant 0 : index
    %6 = vector.load %arg5[%c0_4, %c0_5] : memref<1x128xf32, #tpu.memory_space<vmem>>, vector<1x128xf32>
    %cst_6 = arith.constant 2.000000e+00 : f32
    %7 = vector.broadcast %cst_6 : f32 to vector<8x128xf32>
    %8 = arith.mulf %7, %5 : vector<8x128xf32>
    %9 = vector.broadcast %6 : vector<1x128xf32> to vector<8x128xf32>
    %10 = arith.subf %9, %8 : vector<8x128xf32>
    %c0_7 = arith.constant 0 : index
    %c0_8 = arith.constant 0 : index
    %11 = vector.load %arg6[%c0_7, %c0_8] : memref<8x1xi32, #tpu.memory_space<vmem>>, vector<8x1xi32>
    %c0_9 = arith.constant 0 : index
    %c0_10 = arith.constant 0 : index
    %12 = vector.load %arg7[%c0_9, %c0_10] : memref<1x128xi32, #tpu.memory_space<vmem>>, vector<1x128xi32>
    %13 = vector.broadcast %11 : vector<8x1xi32> to vector<8x128xi32>
    %14 = vector.broadcast %12 : vector<1x128xi32> to vector<8x128xi32>
    %15 = arith.cmpi eq, %13, %14 : vector<8x128xi32>
    %c0_11 = arith.constant 0 : index
    %c0_12 = arith.constant 0 : index
    %16 = vector.load %arg9[%c0_11, %c0_12] : memref<8x1xf32, #tpu.memory_space<vmem>>, vector<8x1xf32>
    %cst_13 = arith.constant 0xFF800000 : f32
    %17 = vector.broadcast %cst_13 : f32 to vector<8x128xf32>
    %18 = arith.select %15, %10, %17 : vector<8x128xi1>, vector<8x128xf32>
    %cst_14 = arith.constant dense<0xFF800000> : vector<8xf32>
    %19 = vector.multi_reduction <maximumf>, %18, %cst_14 [1] : vector<8x128xf32> to vector<8xf32>
    %20 = vector.shape_cast %19 : vector<8xf32> to vector<8x1xf32>
    %21 = arith.maximumf %16, %20 : vector<8x1xf32>
    %c0_15 = arith.constant 0 : index
    %c0_16 = arith.constant 0 : index
    %22 = vector.load %arg9[%c0_15, %c0_16] : memref<8x1xf32, #tpu.memory_space<vmem>>, vector<8x1xf32>
    tpu.vector_store %arg9[%c0_15, %c0_16], %21 {strides = array<i32>} : memref<8x1xf32, #tpu.memory_space<vmem>>, vector<8x1xf32>,
    %c0_17 = arith.constant 0 : index
    %c0_18 = arith.constant 0 : index
    %23 = vector.load %arg10[%c0_17, %c0_18] : memref<8x1xf32, #tpu.memory_space<vmem>>, vector<8x1xf32>
    %cst_19 = arith.constant 0x7F800000 : f32
    %24 = vector.broadcast %cst_19 : f32 to vector<8x128xf32>
    %25 = arith.select %15, %24, %10 : vector<8x128xi1>, vector<8x128xf32>
    %cst_20 = arith.constant dense<0x7F800000> : vector<8xf32>
    %26 = vector.multi_reduction <minimumf>, %25, %cst_20 [1] : vector<8x128xf32> to vector<8xf32>
    %27 = vector.shape_cast %26 : vector<8xf32> to vector<8x1xf32>
    %28 = arith.minimumf %23, %27 : vector<8x1xf32>
    %c0_21 = arith.constant 0 : index
    %c0_22 = arith.constant 0 : index
    %29 = vector.load %arg10[%c0_21, %c0_22] : memref<8x1xf32, #tpu.memory_space<vmem>>, vector<8x1xf32>
    tpu.vector_store %arg10[%c0_21, %c0_22], %28 {strides = array<i32>} : memref<8x1xf32, #tpu.memory_space<vmem>>, vector<8x1xf32>,
    %c0_i32_23 = arith.constant 0 : i32
    %30 = arith.cmpi eq, %arg1, %c0_i32_23 : i32
    %31 = arith.extui %30 : i1 to i32
    %c0_i32_24 = arith.constant 0 : i32
    %32 = arith.cmpi ne, %31, %c0_i32_24 : i32
    scf.if %32 {
      %c0_25 = arith.constant 0 : index
      %c0_26 = arith.constant 0 : index
      %33 = vector.load %arg4[%c0_25, %c0_26] : memref<8x1xf32, #tpu.memory_space<vmem>>, vector<8x1xf32>
      %c0_27 = arith.constant 0 : index
      %c0_28 = arith.constant 0 : index
      %34 = vector.load %arg9[%c0_27, %c0_28] : memref<8x1xf32, #tpu.memory_space<vmem>>, vector<8x1xf32>
      %35 = arith.addf %33, %34 : vector<8x1xf32>
      %cst_29 = arith.constant 0.000000e+00 : f32
      %36 = vector.broadcast %cst_29 : f32 to vector<8x1xf32>
      %37 = arith.maximumf %35, %36 : vector<8x1xf32>
      %c0_30 = arith.constant 0 : index
      %c0_31 = arith.constant 0 : index
      %38 = vector.load %arg10[%c0_30, %c0_31] : memref<8x1xf32, #tpu.memory_space<vmem>>, vector<8x1xf32>
      %39 = arith.addf %33, %38 : vector<8x1xf32>
      %cst_32 = arith.constant 0.000000e+00 : f32
      %40 = vector.broadcast %cst_32 : f32 to vector<8x1xf32>
      %41 = arith.maximumf %39, %40 : vector<8x1xf32>
      %42 = arith.subf %37, %41 : vector<8x1xf32>
      %cst_33 = arith.constant 3.000000e-01 : f32
      %43 = vector.broadcast %cst_33 : f32 to vector<8x1xf32>
      %44 = arith.addf %42, %43 : vector<8x1xf32>
      %cst_34 = arith.constant 0.000000e+00 : f32
      %45 = vector.broadcast %cst_34 : f32 to vector<8x1xf32>
      %46 = arith.maximumf %44, %45 : vector<8x1xf32>
      %c0_35 = arith.constant 0 : index
      %c0_36 = arith.constant 0 : index
      %47 = vector.load %arg8[%c0_35, %c0_36] : memref<8x1xf32, #tpu.memory_space<vmem>>, vector<8x1xf32>
      tpu.vector_store %arg8[%c0_35, %c0_36], %46 {strides = array<i32>} : memref<8x1xf32, #tpu.memory_space<vmem>>, vector<8x1xf32>,
    } else {
    }
    return
  }
  func.func @transform_0(%arg0: i32, %arg1: i32) -> (i32, i32) {
    %c0_i32 = arith.constant 0 : i32
    %c0_i32_0 = arith.constant 0 : i32
    return %arg0, %c0_i32 : i32, i32
  }
  func.func @transform_1(%arg0: i32, %arg1: i32) -> (i32, i32) {
    %c0_i32 = arith.constant 0 : i32
    %c0_i32_0 = arith.constant 0 : i32
    return %c0_i32, %arg1 : i32, i32
  }
  func.func @transform_2(%arg0: i32, %arg1: i32) -> (i32, i32) {
    %c0_i32 = arith.constant 0 : i32
    %c0_i32_0 = arith.constant 0 : i32
    return %arg0, %c0_i32 : i32, i32
  }
  func.func @transform_3(%arg0: i32, %arg1: i32) -> (i32, i32) {
    %c0_i32 = arith.constant 0 : i32
    %c0_i32_0 = arith.constant 0 : i32
    return %c0_i32, %arg1 : i32, i32
  }
  func.func @transform_4(%arg0: i32, %arg1: i32) -> (i32, i32) {
    %c0_i32 = arith.constant 0 : i32
    %c0_i32_0 = arith.constant 0 : i32
    return %arg0, %c0_i32 : i32, i32
  }
  func.func @transform_5(%arg0: i32, %arg1: i32) -> (i32, i32) {
    %c0_i32 = arith.constant 0 : i32
    %c0_i32_0 = arith.constant 0 : i32
    return %c0_i32, %arg1 : i32, i32
  }
  func.func @transform_6(%arg0: i32, %arg1: i32) -> (i32, i32) {
    %c0_i32 = arith.constant 0 : i32
    %c0_i32_0 = arith.constant 0 : i32
    return %arg0, %c0_i32 : i32, i32
  }
}

</mosaic_0001>

<bundles_post_ra>
// kernel: tpu_custom_call.1
= control target key start
LH: loop header
LB: loop body
LE: loop exit
PB: predicated region body
PF: predicated region fallthrough
CT: control target
= control target key end

     0   :  { %11 = vsyncpa [#allocation5], 0  ;;  %s294_s21 = smov [#allocation4]   ;;  %s373_s0 = inlined_call_operand.vmem [shape: f32[8,128], index: 0, kind: input, shape index: {}]   ;;  %s374_s1 = inlined_call_operand.hbm [shape: f32[128,128], index: 1, kind: input, shape index: {}]   ;;  %s375_s2 = inlined_call_operand.vmem [shape: f32[8,1], index: 2, kind: input, shape index: {}]   ;;  %s376_s3 = inlined_call_operand.vmem [shape: f32[1,128], index: 3, kind: input, shape index: {}]   ;;  %s377_s4 = inlined_call_operand.vmem [shape: s32[8,1], index: 4, kind: input, shape index: {}]   ;;  %s378_s5 = inlined_call_operand.vmem [shape: s32[1,128], index: 5, kind: input, shape index: {}]   ;;  %s379_s6 = inlined_call_operand.vmem [shape: f32[8,1], index: 6, kind: output, shape index: {}]  }
   0x1   :  { %s19_s22 = sshll.u32 %s294_s21, 4  ;;  %s270_s25 = scalar_lea.hbm %s374_s1, 2048  ;;  %s20_s22 = int_to_ptr.vmem [resolvable:$true] %s19_s22 }
   0x2   :  { %p271_p0 = scmp.ne.s32.totalorder %s374_s1, %s270_s25  ;;  %p274_p1 = scmp.lt.u32.totalorder %s270_s25, %s374_s1 }
   0x4   :  { %p276_p2 = pnand %p274_p1, %p271_p0 }
   0x6   :  { %279 = shalt.err (!%p276_p2)
}
   0x7   :  { %s280_s30 = scalar_lea.vmem %s20_s22, 2048  ;;  %p285_p4 = scmp.lt.s32.totalorder %s20_s22, %s20_s22 }
   0x8   :  { %p281_p3 = scmp.ne.s32.totalorder %s20_s22, %s280_s30  ;;  %p286_p5 = scmp.lt.s32.totalorder %s280_s30, %s280_s30 }
   0xa   :  { %p287_p6 = por %p286_p5, %p285_p4 }
   0xc   :  { %p288_p7 = pnand %p287_p6, %p281_p3 }
   0xe   :  { %291 = shalt.err (!%p288_p7)
}
   0xf   :  { %s295_s7 = smov 128   ;;  %s296_s8 = smov 8  }
  0x10   :  { %25 = dma.hbm_to_vmem [thread:$0]  %s374_s1, 2048, %s20_s22, [#allocation5], %s295_s7, %s295_s7, %s296_s8  }
  0x11   :  { %292 = dma.done.wait [#allocation5], 2048  }
  0x12   :  { %293 = vsyncadd [#allocation5], 4294965248  ;;  %v297_v0 = vmov 0.0|0.0   ;;  %vm298_vm0 = vmmov 0   ;;  %v299_v1 = vmov 0.0   ;;  %v300_v2 = vmov 0  }
  0x13   :  { %236 = vmatprep.subr.bf16.mxu0 %v297_v0  ;;  %233 = vmatprep.mubr.msk.f32.mxu0 %vm298_vm0, %v299_v1  ;;  %v45_v3 = vld [vmem:[#allocation4] sm:$0xff]  ;;  %v46_v4 = vld [vmem:[#allocation4 + $0x8] sm:$0xff]  ;;  %v47_v5 = vld [vmem:[#allocation4 + $0x10] sm:$0xff]  ;;  %vm41_vm1 = vcmask 7168   ;;  %v301_v29 = vmov inf   ;;  %v302_v39 = vmov -inf  }
  0x14   :  { %269 = vset.pattern.permute.xlu0 %v300_v2  ;;  %v237_v6 = vpack.c.bf16 %v46_v4, %v45_v3  ;;  %v48_v7 = vld [vmem:[#allocation4 + $0x18] sm:$0xff]  ;;  %v49_v9 = vld [vmem:[#allocation4 + $0x20] sm:$0xff]  ;;  %v50_v10 = vld [vmem:[#allocation4 + $0x28] sm:$0xff]  ;;  %43 = vst.msk [vmem:[#allocation3] sm:$0xff] %vm41_vm1, %v301_v29 }
  0x15   :  { %v240_v8 = vpack.c.bf16 %v48_v7, %v47_v5  ;;  %v140_v11 = vld [vmem:[%s377_s4] sm:$0xff]  ;;  %v243_v12 = vpack.c.bf16 %v50_v10, %v49_v9  ;;  %v52_v14 = vld [vmem:[#allocation4 + $0x38] sm:$0xff]  ;;  %v53_v16 = vld [vmem:[#allocation4 + $0x40] sm:$0xff]  ;;  %42 = vst.msk [vmem:[#allocation2] sm:$0xff] %vm41_vm1, %v302_v39 }
  0x16   :  { %238 = vmatpush3.bf16.msra.mxu0 %v237_v6  ;;  %143 = vperm.xlu0 %269, %v140_v11   ;;  %v51_v13 = vld [vmem:[#allocation4 + $0x30] sm:$0xff]  ;;  %v54_v17 = vld [vmem:[#allocation4 + $0x48] sm:$0xff]  ;;  %v56_v20 = vld [vmem:[#allocation4 + $0x58] sm:$0xff] }
  0x17   :  { %239 = vmatprep.subr.bf16.mxu0 %v297_v0  ;;  %v246_v15 = vpack.c.bf16 %v52_v14, %v51_v13  ;;  %v249_v18 = vpack.c.bf16 %v54_v17, %v53_v16  ;;  %v55_v19 = vld [vmem:[#allocation4 + $0x50] sm:$0xff]  ;;  %v57_v22 = vld [vmem:[#allocation4 + $0x60] sm:$0xff]  ;;  %v58_v23 = vld [vmem:[#allocation4 + $0x68] sm:$0xff] }
  0x18   :  { %v252_v21 = vpack.c.bf16 %v56_v20, %v55_v19  ;;  %v255_v24 = vpack.c.bf16 %v58_v23, %v57_v22  ;;  %v59_v25 = vld [vmem:[#allocation4 + $0x70] sm:$0xff]  ;;  %v60_v26 = vld [vmem:[#allocation4 + $0x78] sm:$0xff] }
  0x19   :  { %v258_v27 = vpack.c.bf16 %v60_v26, %v59_v25  ;;  %v44_v28 = vld [vmem:[%s373_s0] sm:$0xff] }
  0x1a   :  { %241 = vmatpush3.bf16.msra.mxu0 %v240_v8  ;;  %v183_v30 = vld [vmem:[%s378_s5] ss:$0 sm:$0xff] }
  0x1b   :  { %242 = vmatprep.subr.bf16.mxu0 %v297_v0  ;;  %v182_v33 = vld [vmem:[%s376_s3] ss:$0 sm:$0xff]  ;;  %v157_v40 = vld [vmem:[#allocation3] sm:$0xff] }
  0x1c   :  { %v150_v41 = vld [vmem:[#allocation2] sm:$0xff] }
  0x1d   :  { %v166_v46 = vld [vmem:[%s375_s2] sm:$0xff] }
  0x1e   :  { %244 = vmatpush3.bf16.msra.mxu0 %v243_v12 }
  0x1f   :  { %245 = vmatprep.subr.bf16.mxu0 %v297_v0 }
  0x22   :  { %247 = vmatpush3.bf16.msra.mxu0 %v246_v15 }
  0x23   :  { %248 = vmatprep.subr.bf16.mxu0 %v297_v0 }
  0x26   :  { %250 = vmatpush3.bf16.msra.mxu0 %v249_v18 }
  0x27   :  { %251 = vmatprep.subr.bf16.mxu0 %v297_v0 }
  0x2a   :  { %253 = vmatpush3.bf16.msra.mxu0 %v252_v21 }
  0x2b   :  { %254 = vmatprep.subr.bf16.mxu0 %v297_v0 }
  0x2e   :  { %256 = vmatpush3.bf16.msra.mxu0 %v255_v24 }
  0x2f   :  { %257 = vmatprep.subr.bf16.mxu0 %v297_v0 }
  0x32   :  { %259 = vmatpush3.bf16.msra.mxu0 %v258_v27 }
  0x35   :  { %234 = vmatmul.mubr.f32.vlgmr.msra.gmra.mrb[0].mxu0 %v44_v28 }
  0x95   :  { %v144_v31 = vpop.permute.xlu0 %143 }
  0x96   :  { %vm149_vm2 = vcmp.eq.s32.totalorder %v144_v31, %v183_v30 }
 0x108   :  { %v127_v32 = vpop.f32.mrb[0].mxu0 }
 0x109   :  { %v132_v34 = vmul.f32 2.0, %v127_v32  ;;  %v235_v35 = vpop.f32.mrb[1].mxu0 }
 0x10b   :  { %v139_v36 = vsub.f32 %v182_v33, %v132_v34 }
 0x10d   :  { %v158_v37 = vsel %vm149_vm2, inf, %v139_v36  ;;  %v151_v38 = vsel %vm149_vm2, %v139_v36, -inf }
 0x10e   :  { %159 = vmin.xlane.f32.xlu1 %v158_v37  ;;  %152 = vmax.xlane.f32.xlu0 %v151_v38 }
 0x19b   :  { %v160_v42 = vpop.xlane.xlu1 %159  ;;  %v153_v43 = vpop.xlane.xlu0 %152 }
 0x19c   :  { %v161_v44 = vmin.f32 %v157_v40, %v160_v42  ;;  %v154_v45 = vmax.f32 %v150_v41, %v153_v43 }
 0x19e   :  { %162 = vst.msk [vmem:[#allocation3] sm:$0xff] %vm41_vm1, %v161_v44  ;;  %156 = vst.msk [vmem:[#allocation2] sm:$0xff] %vm41_vm1, %v154_v45 }
 0x1a5   :  { %v170_v47 = vld [vmem:[#allocation3] sm:$0xff]  ;;  %v167_v48 = vld [vmem:[#allocation2] sm:$0xff] }
 0x1a6   :  { %v171_v49 = vadd.f32 %v170_v47, %v166_v46  ;;  %v168_v50 = vadd.f32 %v167_v48, %v166_v46 }
 0x1a8   :  { %v172_v51 = vmax.f32 %v171_v49, 0.0  ;;  %v169_v52 = vmax.f32 %v168_v50, 0.0 }
 0x1aa   :  { %v173_v53 = vsub.f32 %v169_v52, %v172_v51 }
 0x1ac   :  { %v174_v54 = vadd.f32 0.3, %v173_v53 }
 0x1ae   :  { %v175_v55 = vmax.f32 %v174_v54, 0.0 }
 0x1b0   :  { %176 = vst.msk [vmem:[%s379_s6] sm:$0xff] %vm41_vm1, %v175_v55 }
 0x1b1   :  { %181 = vsyncpa [#allocation5], 1 }

</bundles_post_ra>
